<compile_context>
chip_gen: v7x
topology: tpu7x:2x2x1
jax: 0.10.0
libtpu: 0.0.40
codegen_flags: <defaults>
</compile_context>

<pallas_src>
import jax
import jax.numpy as jnp
from jax.experimental import pallas as pl
from jax.experimental.pallas import tpu as pltpu


def _mlp_kernel(x_ref, wx_ref, b0_ref, w1h_ref, b1_ref, w2_ref, b2_ref, o_ref):
    # x_ref: (Din, TN) bf16, lane-dense batch tile.
    x = x_ref[...]

    # Fused x-contraction: [W0; W1x] @ x  -> (2H, TN) f32.
    xx = jnp.dot(wx_ref[...], x, preferred_element_type=jnp.float32)

    h = b0_ref.shape[0]
    # layer 0: W0 @ x + b0, ReLU
    h0 = jnp.maximum(xx[:h, :] + b0_ref[...], 0.0)
    # layer 1 (skip): W1h @ h0 + W1x @ x + b1, ReLU
    #   (cat([h0, x]) @ W1^T  ==  W1[:, :H] @ h0 + W1[:, H:] @ x, transposed)
    h1 = (jnp.dot(w1h_ref[...], h0.astype(w1h_ref.dtype),
                  preferred_element_type=jnp.float32)
          + xx[h:, :] + b1_ref[...])
    h1 = jnp.maximum(h1, 0.0)
    # layer 2: W2 @ h1 + b2 (no activation)
    out = jnp.dot(w2_ref[...], h1.astype(w2_ref.dtype),
                  preferred_element_type=jnp.float32) + b2_ref[...]
    o_ref[...] = out.astype(o_ref.dtype)


def mlp_forward(x, params, *, block_cols=512, vmem_limit_bytes=32 * 1024 * 1024):
    """x: (N, Din) float32.  params: packed dict from init_params.

    Returns (N, Dout) float32.
    """
    assert block_cols % 128 == 0, "batch tile must be lane-aligned (multiple of 128)"
    n, din = x.shape
    two_h, din_w = params["wx"].shape
    assert din == din_w
    hdim = params["b0"].shape[0]
    dout = params["b2"].shape[0]
    cdt = params["wx"].dtype

    # Pad the batch to a tile multiple and go lane-dense: (Din, Npad).
    n_pad = pl.cdiv(n, block_cols) * block_cols
    x_t = jnp.zeros((din, n_pad), cdt).at[:, :n].set(x.T.astype(cdt))

    grid = (n_pad // block_cols,)

    def col_map(i):
        return (0, i)

    def full(a):  # resident (un-tiled) weight / bias block
        return pl.BlockSpec(a.shape, lambda i: (0, 0))

    flops = 2 * n_pad * (din * two_h + hdim * hdim + hdim * dout)
    bytes_accessed = (
        x_t.size * x_t.dtype.itemsize
        + n_pad * dout * 4
        + sum(int(params[k].size) * params[k].dtype.itemsize
              for k in ("wx", "w1h", "w2", "b0", "b1", "b2")))

    out_t = pl.pallas_call(
        _mlp_kernel,
        out_shape=jax.ShapeDtypeStruct((dout, n_pad), jnp.float32),
        grid_spec=pltpu.PrefetchScalarGridSpec(
            num_scalar_prefetch=0,
            grid=grid,
            in_specs=[
                pl.BlockSpec((din, block_cols), col_map),   # x tile (lane-dense)
                full(params["wx"]), full(params["b0"]),
                full(params["w1h"]), full(params["b1"]),
                full(params["w2"]), full(params["b2"]),
            ],
            out_specs=pl.BlockSpec((dout, block_cols), col_map),
        ),
        compiler_params=pltpu.CompilerParams(
            dimension_semantics=("parallel",),      # shards steps across v7x's 2 TCs
            vmem_limit_bytes=vmem_limit_bytes,      # ample for 2x double-buffered
        ),                                          # (Din+Dout)*TN tiles on all gens
        cost_estimate=pl.CostEstimate(
            flops=flops, transcendentals=0, bytes_accessed=bytes_accessed),
    )(x_t, params["wx"], params["b0"], params["w1h"], params["b1"],
      params["w2"], params["b2"])

    return out_t[:, :n].T


def init_params(key, in_dims, hidden_dims, out_dims, compute_dtype=jnp.bfloat16):
    """Deterministic synthetic init (PyTorch-Linear-like uniform bounds).

    Returns (packed_params_for_kernel, raw_torch_layout_f32_params).
    """
    ks = jax.random.split(key, 6)

    def lin(kw, kb, fan_in, fan_out):
        bound = fan_in ** -0.5
        w = jax.random.uniform(kw, (fan_out, fan_in), jnp.float32, -bound, bound)
        b = jax.random.uniform(kb, (fan_out,), jnp.float32, -bound, bound)
        return w, b

    w0, b0 = lin(ks[0], ks[1], in_dims, hidden_dims)
    w1, b1 = lin(ks[2], ks[3], in_dims + hidden_dims, hidden_dims)
    w2, b2 = lin(ks[4], ks[5], hidden_dims, out_dims)
    raw = (w0, b0, w1, b1, w2, b2)

    # torch forward does cat([h0, input]); W1's first H columns act on h0,
    # its last Din columns act on the original input.
    w1h, w1x = w1[:, :hidden_dims], w1[:, hidden_dims:]
    packed = {
        "wx": jnp.concatenate([w0, w1x], axis=0).astype(compute_dtype),  # (2H, Din)
        "w1h": w1h.astype(compute_dtype),                                # (H, H)
        "w2": w2.astype(compute_dtype),                                  # (Dout, H)
        "b0": b0.reshape(-1, 1),                                         # (H, 1) f32
        "b1": b1.reshape(-1, 1),
        "b2": b2.reshape(-1, 1),
    }
    return packed, raw


def mlp_reference_matched(x, p):
    """Pure-JAX reference using the exact same bf16/f32 cast pattern as the kernel."""
    cdt = p["wx"].dtype
    xt = x.T.astype(cdt)
    h = p["b0"].shape[0]
    xx = jnp.dot(p["wx"], xt, preferred_element_type=jnp.float32)
    h0 = jnp.maximum(xx[:h] + p["b0"], 0.0)
    h1 = jnp.maximum(
        jnp.dot(p["w1h"], h0.astype(cdt), preferred_element_type=jnp.float32)
        + xx[h:] + p["b1"], 0.0)
    out = jnp.dot(p["w2"], h1.astype(cdt), preferred_element_type=jnp.float32) + p["b2"]
    return out.T


def mlp_reference_f32(x, raw):
    """Full-precision reference matching the PyTorch forward semantics."""
    w0, b0, w1, b1, w2, b2 = raw
    inp = x
    h = jnp.maximum(x @ w0.T + b0, 0.0)
    h = jnp.concatenate([h, inp], axis=-1)          # cat([h0, input], -1)
    h = jnp.maximum(h @ w1.T + b1, 0.0)
    return h @ w2.T + b2


if __name__ == "__main__":
    in_dims, hidden_dims, out_dims = 4, 32, 8
    n = 300  # deliberately NOT a multiple of the tile -> exercises padded tail

    key = jax.random.PRNGKey(0)
    kx, kp = jax.random.split(key)
    x = jax.random.normal(kx, (n, in_dims), jnp.float32)
    packed, raw = init_params(kp, in_dims, hidden_dims, out_dims)

    # block_cols=256 keeps the example small while still giving 2 parallel
    # grid steps (pads 300 -> 512); production sizes would sweep 256-1024.
    out = mlp_forward(x, packed, block_cols=256)
    out = jax.block_until_ready(out)
    assert out.shape == (n, out_dims)

    ref_matched = mlp_reference_matched(x, packed)   # same bf16 math as kernel
    ref_f32 = mlp_reference_f32(x, raw)              # exact module semantics (f32)
    assert jnp.allclose(out, ref_matched, atol=1e-3, rtol=1e-3), \
        "mismatch vs bit-matched bf16 reference"
    assert jnp.allclose(out, ref_f32, atol=1e-1, rtol=1e-1), \
        "mismatch vs f32 module-semantics reference"

    print("KERNEL_OK")
</pallas_src>

<mosaic_0001>
module attributes {stable_mosaic.version = 11 : i64} {
  func.func @_mlp_kernel(%arg0: i32, %arg1: memref<4x256xbf16, #tpu.memory_space<vmem>>, %arg2: memref<64x4xbf16, #tpu.memory_space<vmem>>, %arg3: memref<32x1xf32, #tpu.memory_space<vmem>>, %arg4: memref<32x32xbf16, #tpu.memory_space<vmem>>, %arg5: memref<32x1xf32, #tpu.memory_space<vmem>>, %arg6: memref<8x32xbf16, #tpu.memory_space<vmem>>, %arg7: memref<8x1xf32, #tpu.memory_space<vmem>>, %arg8: memref<8x256xf32, #tpu.memory_space<vmem>>) attributes {dimension_semantics = [#tpu.dimension_semantics<parallel>], iteration_bounds = array<i64: 2>, scalar_prefetch = 0 : i64, scratch_operands = 0 : i64, tpu.core_type = #tpu.core_type<tc>, window_params = [{transform_indices = @transform_0, window_bounds = array<i64: 4, 256>}, {pipeline_mode = #tpu.pipeline_mode<synchronous>, transform_indices = @transform_1, window_bounds = array<i64: 64, 4>}, {pipeline_mode = #tpu.pipeline_mode<synchronous>, transform_indices = @transform_2, window_bounds = array<i64: 32, 1>}, {pipeline_mode = #tpu.pipeline_mode<synchronous>, transform_indices = @transform_3, window_bounds = array<i64: 32, 32>}, {pipeline_mode = #tpu.pipeline_mode<synchronous>, transform_indices = @transform_4, window_bounds = array<i64: 32, 1>}, {pipeline_mode = #tpu.pipeline_mode<synchronous>, transform_indices = @transform_5, window_bounds = array<i64: 8, 32>}, {pipeline_mode = #tpu.pipeline_mode<synchronous>, transform_indices = @transform_6, window_bounds = array<i64: 8, 1>}, {transform_indices = @transform_7, window_bounds = array<i64: 8, 256>}]} {
    %c0 = arith.constant 0 : index
    %c0_0 = arith.constant 0 : index
    %0 = vector.load %arg1[%c0, %c0_0] : memref<4x256xbf16, #tpu.memory_space<vmem>>, vector<4x256xbf16>
    %c0_1 = arith.constant 0 : index
    %c0_2 = arith.constant 0 : index
    %1 = vector.load %arg2[%c0_1, %c0_2] : memref<64x4xbf16, #tpu.memory_space<vmem>>, vector<64x4xbf16>
    %cst = arith.constant dense<0.000000e+00> : vector<64x256xf32>
    %2 = tpu.matmul %1, %0, %cst {dimension_numbers = #tpu.dot_dimension_numbers<[1], [0], [0], [1], [0, 0, 1, 1], [], []>} : vector<64x4xbf16>, vector<4x256xbf16>, vector<64x256xf32> -> vector<64x256xf32>
    %3 = vector.extract_strided_slice %2 {offsets = [0, 0], sizes = [32, 256], strides = [1, 1]} : vector<64x256xf32> to vector<32x256xf32>
    %c0_3 = arith.constant 0 : index
    %c0_4 = arith.constant 0 : index
    %4 = vector.load %arg3[%c0_3, %c0_4] : memref<32x1xf32, #tpu.memory_space<vmem>>, vector<32x1xf32>
    %5 = vector.broadcast %4 : vector<32x1xf32> to vector<32x256xf32>
    %6 = arith.addf %3, %5 : vector<32x256xf32>
    %cst_5 = arith.constant 0.000000e+00 : f32
    %7 = vector.broadcast %cst_5 : f32 to vector<32x256xf32>
    %8 = arith.maximumf %6, %7 : vector<32x256xf32>
    %c0_6 = arith.constant 0 : index
    %c0_7 = arith.constant 0 : index
    %9 = vector.load %arg4[%c0_6, %c0_7] : memref<32x32xbf16, #tpu.memory_space<vmem>>, vector<32x32xbf16>
    %10 = arith.truncf %8 : vector<32x256xf32> to vector<32x256xbf16>
    %cst_8 = arith.constant dense<0.000000e+00> : vector<32x256xf32>
    %11 = tpu.matmul %9, %10, %cst_8 {dimension_numbers = #tpu.dot_dimension_numbers<[1], [0], [0], [1], [0, 0, 1, 1], [], []>} : vector<32x32xbf16>, vector<32x256xbf16>, vector<32x256xf32> -> vector<32x256xf32>
    %12 = vector.extract_strided_slice %2 {offsets = [32, 0], sizes = [32, 256], strides = [1, 1]} : vector<64x256xf32> to vector<32x256xf32>
    %13 = arith.addf %11, %12 : vector<32x256xf32>
    %c0_9 = arith.constant 0 : index
    %c0_10 = arith.constant 0 : index
    %14 = vector.load %arg5[%c0_9, %c0_10] : memref<32x1xf32, #tpu.memory_space<vmem>>, vector<32x1xf32>
    %15 = vector.broadcast %14 : vector<32x1xf32> to vector<32x256xf32>
    %16 = arith.addf %13, %15 : vector<32x256xf32>
    %cst_11 = arith.constant 0.000000e+00 : f32
    %17 = vector.broadcast %cst_11 : f32 to vector<32x256xf32>
    %18 = arith.maximumf %16, %17 : vector<32x256xf32>
    %c0_12 = arith.constant 0 : index
    %c0_13 = arith.constant 0 : index
    %19 = vector.load %arg6[%c0_12, %c0_13] : memref<8x32xbf16, #tpu.memory_space<vmem>>, vector<8x32xbf16>
    %20 = arith.truncf %18 : vector<32x256xf32> to vector<32x256xbf16>
    %cst_14 = arith.constant dense<0.000000e+00> : vector<8x256xf32>
    %21 = tpu.matmul %19, %20, %cst_14 {dimension_numbers = #tpu.dot_dimension_numbers<[1], [0], [0], [1], [0, 0, 1, 1], [], []>} : vector<8x32xbf16>, vector<32x256xbf16>, vector<8x256xf32> -> vector<8x256xf32>
    %c0_15 = arith.constant 0 : index
    %c0_16 = arith.constant 0 : index
    %22 = vector.load %arg7[%c0_15, %c0_16] : memref<8x1xf32, #tpu.memory_space<vmem>>, vector<8x1xf32>
    %23 = vector.broadcast %22 : vector<8x1xf32> to vector<8x256xf32>
    %24 = arith.addf %21, %23 : vector<8x256xf32>
    %c0_17 = arith.constant 0 : index
    %c0_18 = arith.constant 0 : index
    %25 = vector.load %arg8[%c0_17, %c0_18] : memref<8x256xf32, #tpu.memory_space<vmem>>, vector<8x256xf32>
    tpu.vector_store %arg8[%c0_17, %c0_18], %24 {strides = array<i32>} : memref<8x256xf32, #tpu.memory_space<vmem>>, vector<8x256xf32>,
    return
  }
  func.func @transform_0(%arg0: i32) -> (i32, i32) {
    %c0_i32 = arith.constant 0 : i32
    %c0_i32_0 = arith.constant 0 : i32
    return %c0_i32, %arg0 : i32, i32
  }
  func.func @transform_1(%arg0: i32) -> (i32, i32) {
    %c0_i32 = arith.constant 0 : i32
    %c0_i32_0 = arith.constant 0 : i32
    %c0_i32_1 = arith.constant 0 : i32
    return %c0_i32, %c0_i32_0 : i32, i32
  }
  func.func @transform_2(%arg0: i32) -> (i32, i32) {
    %c0_i32 = arith.constant 0 : i32
    %c0_i32_0 = arith.constant 0 : i32
    %c0_i32_1 = arith.constant 0 : i32
    return %c0_i32, %c0_i32_0 : i32, i32
  }
  func.func @transform_3(%arg0: i32) -> (i32, i32) {
    %c0_i32 = arith.constant 0 : i32
    %c0_i32_0 = arith.constant 0 : i32
    %c0_i32_1 = arith.constant 0 : i32
    return %c0_i32, %c0_i32_0 : i32, i32
  }
  func.func @transform_4(%arg0: i32) -> (i32, i32) {
    %c0_i32 = arith.constant 0 : i32
    %c0_i32_0 = arith.constant 0 : i32
    %c0_i32_1 = arith.constant 0 : i32
    return %c0_i32, %c0_i32_0 : i32, i32
  }
  func.func @transform_5(%arg0: i32) -> (i32, i32) {
    %c0_i32 = arith.constant 0 : i32
    %c0_i32_0 = arith.constant 0 : i32
    %c0_i32_1 = arith.constant 0 : i32
    return %c0_i32, %c0_i32_0 : i32, i32
  }
  func.func @transform_6(%arg0: i32) -> (i32, i32) {
    %c0_i32 = arith.constant 0 : i32
    %c0_i32_0 = arith.constant 0 : i32
    %c0_i32_1 = arith.constant 0 : i32
    return %c0_i32, %c0_i32_0 : i32, i32
  }
  func.func @transform_7(%arg0: i32) -> (i32, i32) {
    %c0_i32 = arith.constant 0 : i32
    %c0_i32_0 = arith.constant 0 : i32
    return %c0_i32, %arg0 : i32, i32
  }
}

</mosaic_0001>

<bundles_post_ra>
// kernel: tpu_custom_call.1
= control target key start
LH: loop header
LB: loop body
LE: loop exit
PB: predicated region body
PF: predicated region fallthrough
CT: control target
= control target key end

     0   :  { %12 = vsyncpa [#allocation3], 0  ;;  %s1056_s0 = inlined_call_operand.vmem [shape: bf16[4,512], index: 0, kind: input, shape index: {}]   ;;  %s1057_s1 = inlined_call_operand.vmem [shape: bf16[64,4], index: 1, kind: input, shape index: {}]   ;;  %s1058_s2 = inlined_call_operand.vmem [shape: f32[32,1], index: 2, kind: input, shape index: {}]   ;;  %s1059_s3 = inlined_call_operand.vmem [shape: bf16[32,32], index: 3, kind: input, shape index: {}]   ;;  %s1060_s4 = inlined_call_operand.vmem [shape: f32[32,1], index: 4, kind: input, shape index: {}]   ;;  %s1061_s5 = inlined_call_operand.vmem [shape: bf16[8,32], index: 5, kind: input, shape index: {}]   ;;  %s1062_s6 = inlined_call_operand.vmem [shape: f32[8,1], index: 6, kind: input, shape index: {}]   ;;  %s1063_s7 = inlined_call_operand.hbm [shape: f32[8,512], index: 7, kind: output, shape index: {}]  }
   0x1   :  { %14 = vsyncpa [#allocation3 + $0x1], 0  ;;  %s893_s24 = smov 0   ;;  %s895_s25 = smov 0  }
   0x2   :  { %s897_s26 = smov 0   ;;  %s899_s27 = smov 0  }
   0x3 LB: > { %s914_s28 = sadd.s32 4294967295, %s849_s27   ;;  %s701_s29 = sadd.s32 4294967294, %s849_s27   ;;  %s849_s27 = sphi %s899_s27, %s1069_s27   ;;  %s845_s26 = sphi %s897_s26, %s1068_s26   ;;  %s841_s25 = sphi %s895_s25, %s1067_s25   ;;  %s837_s24 = sphi %s893_s24, %s1066_s24  }
   0x4   : > { %s918_s30 = sadd.s32 1, %s849_s27   ;;  %s179_s8 = sadd.s32 1, %s845_s26 }
   0x5   : > { %s176_s9 = ssub.s32 %s849_s27, %s918_s30  ;;  %p189_p0 = scmp.ne.s32.totalorder %s845_s26, %s841_s25 }
   0x6   : > { %p177_p1 = scmp.eq.s32.totalorder %s176_s9, 0  ;;  %p190_p2 = scmp.eq.s32.totalorder %s914_s28, 1 }
   0x7   : > { %p195_p3 = scmp.ne.s32.totalorder %s841_s25, %s837_s24  ;;  %p196_p4 = scmp.eq.s32.totalorder %s701_s29, 1 }
   0x8   : > { %s929_s10 = scalar_select %p177_p1, %s845_s26, %s179_s8  }
   0x9   : > { %p931_p5 = por %p190_p2, %p189_p0  ;;  %p935_p6 = por %p196_p4, %p195_p3 }
   0xa   : > { %p704_p7 = scmp.ge.s32.totalorder %s849_s27, 1  ;;  %p241_p8 = scmp.lt.s32.totalorder %s849_s27, 3 }
   0xc   : > { %p242_p9 = pnand %p704_p7, %p241_p8 }
   0xd   : > { %s706_s13 = sshll.u32 (!%p242_p9), %s914_s28, 1  ;;  %v851_v0 = vmov (!%p242_p9), 0   ;;  %v412_v1 = vld [vmem:[%s1058_s2] sm:$0xff] (!%p242_p9)  ;;  %v414_v2 = vld [vmem:[%s1058_s2 + $0x10] sm:$0xff] (!%p242_p9)  ;;  %v413_v3 = vld [vmem:[%s1058_s2 + $0x8] sm:$0xff] (!%p242_p9)  ;;  %vm332_vm0 = vcmask (!%p242_p9), 1041408  }
   0xe   : > { %245 = sbr.rel (%p242_p9) target bundleno = 724 (0x2d4), region = 48  ;;  %p274_p10 = scmp.lt.s32.totalorder (!%p242_p9), %s706_s13, 3  ;;  %371 = vmatprep.mubr.bf16.mxu0 (!%p242_p9), %v851_v0  ;;  %381 = vmatprep.mubr.bf16.mxu1 (!%p242_p9), %v851_v0  ;;  %v415_v4 = vld [vmem:[%s1058_s2 + $0x18] sm:$0xff] (!%p242_p9)  ;;  %v530_v8 = vld [vmem:[%s1060_s4] sm:$0xff] (!%p242_p9)  ;;  %v531_v9 = vld [vmem:[%s1060_s4 + $0x8] sm:$0xff] (!%p242_p9)  ;;  %vm319_vm1 = vcmask (!%p242_p9), 31744  }
   0xf   : > { %779 = vset.pattern.permute.xlu0 (!%p242_p9), %v851_v0  ;;  %780 = vset.pattern.permute.xlu1 (!%p242_p9), %v851_v0  ;;  %v781_v10 = vld [vmem:[%s1057_s1] sm:$0xff] (!%p242_p9)   ;;  %v782_v11 = vld [vmem:[%s1057_s1 + $0x8] sm:$0xff] (!%p242_p9)   ;;  %v532_v12 = vld [vmem:[%s1060_s4 + $0x10] sm:$0xff] (!%p242_p9)  ;;  %vm470_vm2 = vcmask (!%p242_p9), 261120   ;;  %s270_s22 = sand.u32 (!%p242_p9), 1, %s841_s25   ;;  %s728_s29 = sshll.u32 (!%p242_p9), %s914_s28, 8 }
  0x10   : > { %418 = vperm.xlu0 (!%p242_p9), %779, %v412_v1   ;;  %428 = vperm.xlu1 (!%p242_p9), %780, %v414_v2   ;;  %v533_v13 = vld [vmem:[%s1060_s4 + $0x18] sm:$0xff] (!%p242_p9)  ;;  %v575_v14 = vld [vmem:[%s1062_s6] sm:$0xff] (!%p242_p9)  ;;  %v783_v15 = vld [vmem:[%s1057_s1 + $0x10] sm:$0xff] (!%p242_p9)   ;;  %s705_s23 = sshll.u32 (!%p242_p9), %s270_s22, 4  ;;  %s628_s28 = scalar_lea.sflag (!%p242_p9), [#allocation3], %s270_s22 }
  0x11   : > { %v785_v16 = vld [vmem:[%s1057_s1 + $0x18] sm:$0xff] (!%p242_p9)   ;;  %v784_v49 = vld [vmem:[%s1059_s3] sm:$0xff] (!%p242_p9)   ;;  %v786_v50 = vld [vmem:[%s1059_s3 + $0x8] sm:$0xff] (!%p242_p9)   ;;  %s852_s17 = smov (!%p242_p9), [#allocation2]  }
  0x12   : > { %s791_s18 = sshll.u32 (!%p242_p9), %s852_s17, 4  ;;  %s792_s18 = int_to_ptr.vmem [resolvable:$false] %s791_s18 }
  0x13   : > { %s793_s19 = scalar_lea.vmem (!%p242_p9), %s792_s18, 512 }
  0x14   : > { %423 = vperm.xlu0 (!%p242_p9), %779, %v413_v3   ;;  %433 = vperm.xlu1 (!%p242_p9), %780, %v415_v4  }
  0x15   : > { %s1071_s13 = smov (!%p274_p10, %s706_s13), 3 }
  0x16   : > { %s707_s20 = sshll.u32 %s1071_s13, 1  ;;  %s1014_s13 = scalar_lea.hbm %s1063_s7, %s728_s29 }
  0x17   : > { %s277_s8 = scalar_lea.vmem %s1056_s0, %s707_s20 }
  0x18   : > { %v712_v5 = vld.sshfl [vmem:[%s277_s8] sm:$0x33 pattern:$0x76325410]  ;;  %536 = vperm.xlu0 %779, %v530_v8   ;;  %541 = vperm.xlu1 %780, %v531_v9   ;;  %s272_s8 = scalar_lea.vmem [#allocation2], %s705_s23 }
  0x19   : > { %v318_v6 = vcombine.high %v712_v5, %v712_v5  ;;  %v334_v7 = vsel %vm332_vm0, %v712_v5, 0  ;;  %s642_s9 = sshll.u32 %s272_s8, 4  ;;  %s1016_s9 = int_to_ptr.vmem [resolvable:$true] %s642_s9 }
  0x1a   : > { %s787_s16 = scalar_lea.vmem %s1016_s9, 256  ;;  %p794_p0 = scmp.lt.s32.totalorder %s1016_s9, %s792_s18 }
  0x1b   : > { %713 = vmatprep.subr.msk.bf16.mxu0 %vm332_vm0, %v318_v6  ;;  %729 = vmatprep.subr.msk.bf16.mxu1 %vm332_vm0, %v318_v6  ;;  %p788_p11 = scmp.ne.s32.totalorder %s1016_s9, %s787_s16  ;;  %p795_p1 = scmp.lt.s32.totalorder %s793_s19, %s787_s16 }
  0x1c   : > { %340 = vmatpush1.bf16.msra.mxu0 %v334_v7  ;;  %730 = vmatpush1.bf16.msra.mxu1 %v334_v7 }
  0x1d   : > { %546 = vperm.xlu0 %779, %v532_v12   ;;  %551 = vperm.xlu1 %780, %v533_v13   ;;  %p789_p12 = pnand %p788_p11, %p931_p5  ;;  %p796_p2 = por %p795_p1, %p794_p0 }
  0x1f   : > { %714 = vmatmul.mubr.msk.bf16.vlgmr.msra.gmra.mrb[0].mxu0 %vm319_vm1, %v781_v10  ;;  %715 = vmatmul.mubr.msk.bf16.vlgmr.msra.gmra.mrb[0].mxu1 %vm319_vm1, %v782_v11  ;;  %p790_p13 = pneg %p789_p12 }
  0x20   : > { %391 = vmatprep.mubr.bf16.mxu1 %v851_v0  ;;  %509 = vmatprep.mubr.bf16.mxu0 %v851_v0 }
  0x21   : > { %578 = vperm.xlu0 %779, %v575_v14   ;;  %p797_p3 = pnand %p796_p2, %p790_p13 }
  0x27   : > { %716 = vmatmul.mubr.msk.bf16.gmra.mrb[4].mxu1 %vm319_vm1, %v783_v15 }
  0x28   : > { %401 = vmatprep.mubr.bf16.mxu1 %v851_v0 }
  0x2f   : > { %717 = vmatmul.mubr.msk.bf16.gmra.mrb[8].mxu1 %vm319_vm1, %v785_v16 }
  0x30   : > { %616 = vmatprep.mubr.bf16.mxu1 %v851_v0 }
  0x8f   : > { %v419_v17 = vpop.permute.xlu0 %418  ;;  %v429_v18 = vpop.permute.xlu1 %428 }
  0x93   : > { %v424_v19 = vpop.permute.xlu0 %423  ;;  %v434_v20 = vpop.permute.xlu1 %433 }
  0x97   : > { %v537_v62 = vpop.permute.xlu0 %536  ;;  %v542_v4 = vpop.permute.xlu1 %541 }
  0xf2   : > { %v373_v21 = vpop.f32.mrb[0].mxu0  ;;  %v383_v22 = vpop.f32.mrb[0].mxu1 }
  0xf3   : > { %v436_v23 = vadd.f32 %v419_v17, %v373_v21  ;;  %v440_v24 = vadd.f32 %v429_v18, %v383_v22  ;;  %v375_v25 = vpop.f32.mrb[1].mxu0  ;;  %v385_v26 = vpop.f32.mrb[1].mxu1 }
  0xf4   : > { %v437_v27 = vadd.f32 %v419_v17, %v375_v25  ;;  %v441_v28 = vadd.f32 %v429_v18, %v385_v26  ;;  %v377_v29 = vpop.f32.mrb[2].mxu0  ;;  %v387_v30 = vpop.f32.mrb[2].mxu1 }
  0xf5   : > { %v448_v31 = vmax.f32 %v440_v24, 0.0  ;;  %v438_v32 = vadd.f32 %v424_v19, %v377_v29  ;;  %v442_v33 = vadd.f32 %v434_v20, %v387_v30  ;;  %v379_v34 = vpop.f32.mrb[3].mxu0  ;;  %v389_v35 = vpop.f32.mrb[3].mxu1  ;;  %v444_v39 = vmax.f32 %v436_v23, 0.0 }
  0xf6   : > { %v449_v36 = vmax.f32 %v441_v28, 0.0  ;;  %v439_v37 = vadd.f32 %v424_v19, %v379_v34  ;;  %v443_v38 = vadd.f32 %v434_v20, %v389_v35  ;;  %v445_v42 = vmax.f32 %v437_v27, 0.0  ;;  %v547_v17 = vpop.permute.xlu0 %546  ;;  %v552_v24 = vpop.permute.xlu1 %551  ;;  %v570_v35 = vld [vmem:[%s1061_s5] sm:$0xf] }
  0xf7   : > { %v446_v40 = vmax.f32 %v438_v32, 0.0  ;;  %v450_v41 = vmax.f32 %v442_v33, 0.0 }
  0xf8   : > { %v447_v43 = vmax.f32 %v439_v37, 0.0  ;;  %v451_v44 = vmax.f32 %v443_v38, 0.0 }
  0xf9   : > { %v456_v45 = vpack.c.bf16 %v446_v40, %v444_v39  ;;  %v458_v46 = vpack.c.bf16 %v450_v41, %v448_v31 }
  0xfa   : > { %v457_v47 = vpack.c.bf16 %v447_v43, %v445_v42  ;;  %v459_v48 = vpack.c.bf16 %v451_v44, %v449_v36  ;;  %v393_v51 = vpop.f32.mrb[4].mxu1  ;;  %v579_v36 = vpop.permute.xlu0 %578 }
  0xfb   : > { %v395_v52 = vpop.f32.mrb[5].mxu1 }
  0xfc   : > { %477 = vmatprep.subr.bf16.mxu0 %v457_v47  ;;  %v397_v53 = vpop.f32.mrb[6].mxu1 }
  0xfd   : > { %478 = vmatpush1.bf16.msra.mxu0 %v456_v45  ;;  %v399_v54 = vpop.f32.mrb[7].mxu1 }
  0xfe   : > { %479 = vmatprep.subr.bf16.mxu0 %v459_v48 }
 0x101   : > { %480 = vmatpush1.bf16.msra.mxu0 %v458_v46 }
 0x102   : > { %v403_v55 = vpop.f32.mrb[8].mxu1 }
 0x103   : > { %v405_v56 = vpop.f32.mrb[9].mxu1 }
 0x104   : > { %720 = vmatmul.mubr.msk.bf16.vlgmr.msra.gmra.mrb[4].mxu0 %vm470_vm2, %v784_v49  ;;  %v407_v57 = vpop.f32.mrb[10].mxu1 }
 0x105   : > { %519 = vmatprep.mubr.bf16.mxu0 %v851_v0  ;;  %v409_v58 = vpop.f32.mrb[11].mxu1 }
 0x10c   : > { %721 = vmatmul.mubr.msk.bf16.gmra.mrb[8].mxu0 %vm470_vm2, %v786_v50 }
 0x1d7   : > { %v511_v59 = vpop.f32.mrb[4].mxu0 }
 0x1d8   : > { %v512_v60 = vadd.f32 %v511_v59, %v393_v51  ;;  %v513_v61 = vpop.f32.mrb[5].mxu0 }
 0x1d9   : > { %v514_v63 = vadd.f32 %v513_v61, %v395_v52  ;;  %v515_v0 = vpop.f32.mrb[6].mxu0 }
 0x1da   : > { %v554_v1 = vadd.f32 %v537_v62, %v512_v60  ;;  %v516_v2 = vadd.f32 %v515_v0, %v397_v53  ;;  %v517_v3 = vpop.f32.mrb[7].mxu0 }
 0x1db   : > { %v555_v5 = vadd.f32 %v537_v62, %v514_v63  ;;  %v518_v6 = vadd.f32 %v517_v3, %v399_v54 }
 0x1dc   : > { %v556_v7 = vadd.f32 %v542_v4, %v516_v2  ;;  %v562_v9 = vmax.f32 %v554_v1, 0.0 }
 0x1dd   : > { %v557_v8 = vadd.f32 %v542_v4, %v518_v6  ;;  %v563_v11 = vmax.f32 %v555_v5, 0.0 }
 0x1de   : > { %v564_v10 = vmax.f32 %v556_v7, 0.0 }
 0x1df   : > { %v565_v12 = vmax.f32 %v557_v8, 0.0  ;;  %v521_v13 = vpop.f32.mrb[8].mxu0 }
 0x1e0   : > { %v571_v14 = vpack.c.bf16 %v564_v10, %v562_v9  ;;  %v522_v15 = vadd.f32 %v521_v13, %v403_v55  ;;  %v523_v16 = vpop.f32.mrb[9].mxu0 }
 0x1e1   : > { %v524_v18 = vadd.f32 %v523_v16, %v405_v56  ;;  %v525_v19 = vpop.f32.mrb[10].mxu0  ;;  %v572_v20 = vpack.c.bf16 %v565_v12, %v563_v11 }
 0x1e2   : > { %v558_v21 = vadd.f32 %v547_v17, %v522_v15  ;;  %v526_v22 = vadd.f32 %v525_v19, %v407_v57  ;;  %v527_v23 = vpop.f32.mrb[11].mxu0 }
 0x1e3   : > { %v559_v25 = vadd.f32 %v547_v17, %v524_v18  ;;  %v528_v26 = vadd.f32 %v527_v23, %v409_v58  ;;  %584 = vmatprep.subr.bf16.mxu1 %v572_v20 }
 0x1e4   : > { %v560_v27 = vadd.f32 %v552_v24, %v526_v22  ;;  %585 = vmatpush1.bf16.msra.mxu1 %v571_v14  ;;  %v566_v29 = vmax.f32 %v558_v21, 0.0 }
 0x1e5   : > { %v561_v28 = vadd.f32 %v552_v24, %v528_v26  ;;  %v567_v31 = vmax.f32 %v559_v25, 0.0 }
 0x1e6   : > { %v568_v30 = vmax.f32 %v560_v27, 0.0 }
 0x1e7   : > { %v569_v32 = vmax.f32 %v561_v28, 0.0 }
 0x1e8   : > { %v573_v33 = vpack.c.bf16 %v568_v30, %v566_v29 }
 0x1e9   : > { %v574_v34 = vpack.c.bf16 %v569_v32, %v567_v31 }
 0x1eb   : > { %586 = vmatprep.subr.bf16.mxu1 %v574_v34 }
 0x1ec   : > { %587 = vmatpush1.bf16.msra.mxu1 %v573_v33 }
 0x1ef   : > { %722 = vmatmul.mubr.msk.bf16.vlgmr.msra.gmra.mrb[12].mxu1 %vm470_vm2, %v570_v35 }
 0x2c2   : > { %v618_v37 = vpop.f32.mrb[12].mxu1 }
 0x2c3   : > { %v619_v38 = vadd.f32 %v618_v37, %v579_v36  ;;  %v620_v39 = vpop.f32.mrb[13].mxu1 }
 0x2c4   : > { %v621_v40 = vadd.f32 %v620_v39, %v579_v36  ;;  %v622_v41 = vpop.f32.mrb[14].mxu1 }
 0x2c5   : > { %625 = vst [vmem:[%s272_s8] sm:$0xff] %v619_v38  ;;  %v623_v42 = vpop.f32.mrb[15].mxu1 }
 0x2c6   : > { %626 = vst [vmem:[%s272_s8 + $0x8] sm:$0xff] %v621_v40 }
 0x2c7   : > { %800 = shalt.err (!%p797_p3)
}
 0x2c8   : > { %s801_s20 = scalar_lea.hbm %s1014_s13, 256  ;;  %s805_s23 = scalar_lea.hbm %s1063_s7, 512 }
 0x2c9   : > { %p802_p4 = scmp.ne.s32.totalorder %s1014_s13, %s801_s20  ;;  %p806_p9 = scmp.lt.u32.totalorder %s1014_s13, %s1063_s7 }
 0x2ca   : > { %p807_p10 = scmp.lt.u32.totalorder %s805_s23, %s801_s20  ;;  %p809_p12 = scmp.lt.u32.totalorder %s801_s20, %s1014_s13 }
 0x2cb   : > { %p803_p7 = pnand %p802_p4, %p931_p5 }
 0x2cc   : > { %p808_p11 = por %p807_p10, %p806_p9 }
 0x2cd   : > { %p804_p8 = pneg %p803_p7 }
 0x2ce   : > { %p810_p13 = por %p809_p12, %p808_p11 }
 0x2d0   : > { %p811_p0 = pnand %p810_p13, %p804_p8 }
 0x2d2   : > { %814 = shalt.err (!%p811_p0)
}
 0x2d3   : > { %739 = dma.vmem_to_hbm [thread:$0]  (%p931_p5), %s1016_s9, 256, %s1014_s13, %s628_s28  }
 0x2d4 PF: > { %p745_p1 = scmp.ge.s32.totalorder %s849_s27, 2  ;;  %s654_s14 = sand.u32 1, %s837_s24  }
 0x2d5   : > { %s655_s15 = scalar_lea.sflag [#allocation3], %s654_s14 }
 0x2d6   : > { %p742_p2 = pnand %p745_p1, %p935_p6 }
 0x2d8   : > { %832 = dma.done.wait (!%p742_p2), %s655_s15, 256  }
 0x2d9   : > { %834 = vsyncadd (!%p742_p2), %s655_s15, 4294967040  ;;  %p17_p3 = scmp.ge.s32.totalorder %s918_s30, 4   ;;  %s1066_s24 = smov %s841_s25 }
 0x2da   : > { %s1067_s25 = smov %s845_s26  ;;  %s1068_s26 = smov %s929_s10 }
 0x2db   : > { %s1069_s27 = smov %s918_s30  ;;  %19 = sbr.rel (!%p17_p3) target bundleno = 3 (0x3), region = 83 }
 0x2e2   :  { %660 = vsyncpa [#allocation3], 1 }
 0x2e3   :  { %662 = vsyncpa [#allocation3 + $0x1], 1 }

</bundles_post_ra>
